<compile_context>
chip_gen: v5e
topology: v5e:2x2
jax: 0.10.0
libtpu: 0.0.40
codegen_flags: <defaults>
</compile_context>

<pallas_src>
import math

import jax
import jax.numpy as jnp
from jax.experimental import pallas as pl
from jax.experimental.pallas import tpu as pltpu


def _round_up(x, m):
    return ((x + m - 1) // m) * m


# -----------------------------------------------------------------------------
# Pallas kernel: global avg-pool + Linear + tanh(scale * .)  (one batch tile)
# -----------------------------------------------------------------------------
def _hash_head_kernel(scale_ref, x_ref, w_ref, b_ref, o_ref):
    # scale_ref: (1,)         f32 SMEM  -- scale / (H*W)   (scalar-prefetched)
    # x_ref    : (TN, C, HW)  VMEM      -- backbone feature tile (NCHW, HW flat)
    # w_ref    : (C, Bp)      f32 VMEM  -- hash_layer.weight^T, lane-padded
    # b_ref    : (1, Bp)      f32 VMEM  -- scale * hash_layer.bias, lane-padded
    # o_ref    : (TN, Bp)     f32 VMEM

    # Global spatial sum (lane-axis reduce); the 1/HW factor lives in scale_ref.
    s = jnp.sum(x_ref[...].astype(jnp.float32), axis=-1)              # (TN, C)

    # hash_layer matmul on the MXU with f32 accumulation.
    y = jnp.dot(s, w_ref[...], preferred_element_type=jnp.float32)    # (TN, Bp)

    # tanh(scale * (pooled @ W^T + b)) with folded constants.
    o_ref[...] = jnp.tanh(scale_ref[0] * y + b_ref[...])


def hash_head(x_nchw, weight, bias, scale, *, batch_tile=8):
    """x_nchw: (N, C, H, W); weight: (hash_bit, C); bias: (hash_bit,)."""
    n, c, h, w = x_nchw.shape
    hash_bit = weight.shape[0]
    hw = h * w

    # NCHW -> (N, C, HW): contiguous reshape, no HBM transpose/rewrite.
    x = x_nchw.reshape(n, c, hw)

    # Pad batch to a multiple of the batch tile and grid over it.
    n_pad = _round_up(n, 8)
    tn = _round_up(min(batch_tile, n_pad), 8)
    n_pad = _round_up(n_pad, tn)
    if n_pad != n:
        x = jnp.pad(x, ((0, n_pad - n), (0, 0), (0, 0)))

    # Lane-pad hash_bit to a multiple of 128 (unmasked stores, full MXU cols).
    bp = _round_up(hash_bit, 128)
    w_t = weight.T.astype(jnp.float32)                       # (C, hash_bit)
    b = bias.astype(jnp.float32)
    if bp != hash_bit:
        w_t = jnp.pad(w_t, ((0, 0), (0, bp - hash_bit)))
        b = jnp.pad(b, (0, bp - hash_bit))

    # Fold host scale into the bias and 1/HW into the SMEM scalar.
    b2 = (jnp.float32(scale) * b).reshape(1, bp)
    scale_arr = jnp.asarray([float(scale) / float(hw)], dtype=jnp.float32)

    grid = (n_pad // tn,)

    # Advisory cost estimate for XLA scheduling around the (big) backbone.
    x_bytes = x.size * x.dtype.itemsize
    cost = pl.CostEstimate(
        flops=2 * n_pad * c * bp + n_pad * c * hw,
        transcendentals=n_pad * bp,
        bytes_accessed=x_bytes + w_t.size * 4 + bp * 4 + n_pad * bp * 4,
    )

    # Rough VMEM budget: double-buffered x tile + resident weights/bias/out.
    hw_pad = _round_up(hw, 128)
    c_pad = _round_up(c, 8)
    x_tile_bytes = tn * c_pad * hw_pad * x.dtype.itemsize
    vmem_est = 2 * (x_tile_bytes + c_pad * bp * 4 + 8 * bp * 4 + tn * bp * 4)
    vmem_limit = int(min(max(vmem_est + (2 << 20), 16 << 20), 48 << 20))

    out = pl.pallas_call(
        _hash_head_kernel,
        out_shape=jax.ShapeDtypeStruct((n_pad, bp), jnp.float32),
        grid_spec=pltpu.PrefetchScalarGridSpec(
            num_scalar_prefetch=1,                              # scale/HW -> SMEM
            grid=grid,
            in_specs=[
                pl.BlockSpec((tn, c, hw), lambda i, s: (i, 0, 0)),  # x tile
                pl.BlockSpec((c, bp), lambda i, s: (0, 0)),         # W^T (resident)
                pl.BlockSpec((1, bp), lambda i, s: (0, 0)),         # bias (resident)
            ],
            out_specs=pl.BlockSpec((tn, bp), lambda i, s: (i, 0)),
        ),
        compiler_params=pltpu.CompilerParams(
            dimension_semantics=("parallel",),   # shard batch across TCs (v7x)
            vmem_limit_bytes=vmem_limit,
        ),
        cost_estimate=cost,
    )(scale_arr, x, w_t, b2)

    return out[:n, :hash_bit]


# -----------------------------------------------------------------------------
# Module wrapper mirroring ResNext.__init__ / forward (eval mode)
# -----------------------------------------------------------------------------
class ResNextHashHead:
    def __init__(self, in_features, hash_bit, key):
        # hash_layer.weight ~ N(0, 0.01), bias = 0  (deterministic via PRNGKey)
        self.weight = 0.01 * jax.random.normal(
            key, (hash_bit, in_features), dtype=jnp.float32)
        self.bias = jnp.zeros((hash_bit,), dtype=jnp.float32)
        self.iter_num = 0
        self.step_size = 200
        self.gamma = 0.005
        self.power = 0.5
        self.init_scale = 1.0
        self.scale = self.init_scale
        self.training = False

    def __call__(self, feature_map_nchw):
        # TODO(synk): `self.feature_layers`'s ResNext101 conv backbone is not
        # reproduced; `feature_map_nchw` stands in for its (N, C, H, W) output.
        if self.training:
            self.iter_num += 1
        if self.iter_num % self.step_size == 0:
            # Mirrors the original module's quirk of recomputing in eval too.
            self.scale = self.init_scale * math.pow(
                1.0 + self.gamma * self.iter_num, self.power)
        return hash_head(feature_map_nchw, self.weight, self.bias, self.scale)


if __name__ == "__main__":
    key = jax.random.PRNGKey(0)
    k_x, k_w = jax.random.split(key)

    # Small synthetic shapes: batch=2, channels=32 (stand-in for 2048),
    # spatial=4x4 (stand-in for 7x7), hash_bit=16.  Exercises batch padding
    # (2 -> 8), lane padding of HW (16 -> 128) and of hash_bit (16 -> 128).
    N, C, H, W = 2, 32, 4, 4
    HASH_BIT = 16

    x = jax.random.normal(k_x, (N, C, H, W), dtype=jnp.float32)

    model = ResNextHashHead(in_features=C, hash_bit=HASH_BIT, key=k_w)
    out = model(x)
    out = jax.block_until_ready(out)

    # Pure-JAX reference check (avg-pool -> linear -> tanh(scale * .)).
    pooled_ref = jnp.mean(x, axis=(2, 3))                       # (N, C)
    y_ref = pooled_ref @ model.weight.T + model.bias            # (N, hash_bit)
    ref = jnp.tanh(model.scale * y_ref)
    assert out.shape == (N, HASH_BIT)
    assert jnp.allclose(out, ref, atol=1e-5, rtol=1e-5)

    print("KERNEL_OK")
</pallas_src>

<mosaic_0001>
module attributes {stable_mosaic.version = 11 : i64} {
  func.func @_hash_head_kernel(%arg0: i32, %arg1: memref<1xf32, #tpu.memory_space<smem>>, %arg2: memref<8x32x16xf32, #tpu.memory_space<vmem>>, %arg3: memref<32x128xf32, #tpu.memory_space<vmem>>, %arg4: memref<1x128xf32, #tpu.memory_space<vmem>>, %arg5: memref<8x128xf32, #tpu.memory_space<vmem>>) attributes {dimension_semantics = [#tpu.dimension_semantics<parallel>], iteration_bounds = array<i64: 1>, scalar_prefetch = 1 : i64, scratch_operands = 0 : i64, tpu.core_type = #tpu.core_type<tc>, window_params = [{transform_indices = @transform_0, window_bounds = array<i64: 8, 32, 16>}, {pipeline_mode = #tpu.pipeline_mode<synchronous>, transform_indices = @transform_1, window_bounds = array<i64: 32, 128>}, {pipeline_mode = #tpu.pipeline_mode<synchronous>, transform_indices = @transform_2, window_bounds = array<i64: 1, 128>}, {transform_indices = @transform_3, window_bounds = array<i64: 8, 128>}]} {
    %c0 = arith.constant 0 : index
    %c0_0 = arith.constant 0 : index
    %c0_1 = arith.constant 0 : index
    %0 = vector.load %arg2[%c0, %c0_0, %c0_1] : memref<8x32x16xf32, #tpu.memory_space<vmem>>, vector<8x32x16xf32>
    %cst = arith.constant dense<0.000000e+00> : vector<8x32xf32>
    %1 = vector.multi_reduction <add>, %0, %cst [2] : vector<8x32x16xf32> to vector<8x32xf32>
    %c0_2 = arith.constant 0 : index
    %c0_3 = arith.constant 0 : index
    %2 = vector.load %arg3[%c0_2, %c0_3] : memref<32x128xf32, #tpu.memory_space<vmem>>, vector<32x128xf32>
    %cst_4 = arith.constant dense<0.000000e+00> : vector<8x128xf32>
    %3 = tpu.matmul %1, %2, %cst_4 {dimension_numbers = #tpu.dot_dimension_numbers<[1], [0], [0], [1], [0, 0, 1, 1], [], []>} : vector<8x32xf32>, vector<32x128xf32>, vector<8x128xf32> -> vector<8x128xf32>
    %c0_5 = arith.constant 0 : index
    %4 = memref.load %arg1[%c0_5] : memref<1xf32, #tpu.memory_space<smem>>
    %5 = vector.broadcast %4 : f32 to vector<8x128xf32>
    %6 = arith.mulf %5, %3 : vector<8x128xf32>
    %c0_6 = arith.constant 0 : index
    %c0_7 = arith.constant 0 : index
    %7 = vector.load %arg4[%c0_6, %c0_7] : memref<1x128xf32, #tpu.memory_space<vmem>>, vector<1x128xf32>
    %8 = vector.broadcast %7 : vector<1x128xf32> to vector<8x128xf32>
    %9 = arith.addf %6, %8 : vector<8x128xf32>
    %10 = math.tanh %9 : vector<8x128xf32>
    %c0_8 = arith.constant 0 : index
    %c0_9 = arith.constant 0 : index
    %11 = vector.load %arg5[%c0_8, %c0_9] : memref<8x128xf32, #tpu.memory_space<vmem>>, vector<8x128xf32>
    tpu.vector_store %arg5[%c0_8, %c0_9], %10 {strides = array<i32>} : memref<8x128xf32, #tpu.memory_space<vmem>>, vector<8x128xf32>,
    return
  }
  func.func @transform_0(%arg0: i32, %arg1: memref<1xf32, #tpu.memory_space<smem>>) -> (i32, i32, i32) {
    %c0_i32 = arith.constant 0 : i32
    %c0_i32_0 = arith.constant 0 : i32
    %c0_i32_1 = arith.constant 0 : i32
    return %arg0, %c0_i32, %c0_i32_0 : i32, i32, i32
  }
  func.func @transform_1(%arg0: i32, %arg1: memref<1xf32, #tpu.memory_space<smem>>) -> (i32, i32) {
    %c0_i32 = arith.constant 0 : i32
    %c0_i32_0 = arith.constant 0 : i32
    %c0_i32_1 = arith.constant 0 : i32
    return %c0_i32, %c0_i32_0 : i32, i32
  }
  func.func @transform_2(%arg0: i32, %arg1: memref<1xf32, #tpu.memory_space<smem>>) -> (i32, i32) {
    %c0_i32 = arith.constant 0 : i32
    %c0_i32_0 = arith.constant 0 : i32
    %c0_i32_1 = arith.constant 0 : i32
    return %c0_i32, %c0_i32_0 : i32, i32
  }
  func.func @transform_3(%arg0: i32, %arg1: memref<1xf32, #tpu.memory_space<smem>>) -> (i32, i32) {
    %c0_i32 = arith.constant 0 : i32
    %c0_i32_0 = arith.constant 0 : i32
    return %arg0, %c0_i32 : i32, i32
  }
}

</mosaic_0001>

<bundles_post_ra>
// kernel: tpu_custom_call.1
= control target key start
LH: loop header
LB: loop body
LE: loop exit
PB: predicated region body
PF: predicated region fallthrough
CT: control target
= control target key end

     0   :  { %vm49_vm0 = vcmask 130048   ;;  %s584_s0 = inlined_call_operand.<no memory space> [shape: f32[1], index: 0, kind: input, shape index: {}]   ;;  %s585_s1 = inlined_call_operand.vmem [shape: f32[8,32,16], index: 1, kind: input, shape index: {}]   ;;  %s586_s2 = inlined_call_operand.vmem [shape: f32[32,128], index: 2, kind: input, shape index: {}]   ;;  %s587_s3 = inlined_call_operand.vmem [shape: f32[1,128], index: 3, kind: input, shape index: {}]   ;;  %s588_s4 = inlined_call_operand.hbm [shape: f32[8,128], index: 4, kind: output, shape index: {}]  }
   0x1   :  { %v21_v0 = vld [vmem:[%s585_s1 + $0x20] sm:$0xff]  ;;  %v19_v1 = vld [vmem:[%s585_s1 + $0x10] sm:$0xff]  ;;  %v22_v6 = vld [vmem:[%s585_s1 + $0x28] sm:$0xff] }
   0x2   :  { %v17_v2 = vld [vmem:[%s585_s1] sm:$0xff]  ;;  %v62_v3 = vsel %vm49_vm0, %v21_v0, 0.0  ;;  %v56_v4 = vsel %vm49_vm0, %v19_v1, 0.0  ;;  %v23_v7 = vld [vmem:[%s585_s1 + $0x30] sm:$0xff]  ;;  %v18_v8 = vld [vmem:[%s585_s1 + $0x8] sm:$0xff] }
   0x3   :  { %v50_v5 = vsel %vm49_vm0, %v17_v2, 0.0  ;;  %63 = vadd.xlane.f32.xlu1 %v62_v3  ;;  %57 = vadd.xlane.f32.xlu2 %v56_v4 }
   0x4   :  { %51 = vadd.xlane.f32.xlu0 %v50_v5 }
   0x5   :  { %10 = vsyncpa [#allocation5], 0  ;;  %v65_v9 = vsel %vm49_vm0, %v22_v6, 0.0  ;;  %v68_v10 = vsel %vm49_vm0, %v23_v7, 0.0  ;;  %v53_v11 = vsel %vm49_vm0, %v18_v8, 0.0  ;;  %v26_v12 = vld [vmem:[%s585_s1 + $0x48] sm:$0xff]  ;;  %v182_v0 = vlaneseq }
   0x6   :  { %v20_v13 = vld [vmem:[%s585_s1 + $0x18] sm:$0xff]  ;;  %v25_v14 = vld [vmem:[%s585_s1 + $0x40] sm:$0xff]  ;;  %v77_v15 = vsel %vm49_vm0, %v26_v12, 0.0  ;;  %v27_v18 = vld [vmem:[%s585_s1 + $0x50] sm:$0xff]  ;;  %vm187_vm1 = vcmask 130112   ;;  %vm191_vm2 = vcmask 195712  }
   0x7   :  { %v59_v16 = vsel %vm49_vm0, %v20_v13, 0.0  ;;  %v74_v17 = vsel %vm49_vm0, %v25_v14, 0.0  ;;  %v29_v19 = vld [vmem:[%s585_s1 + $0x60] sm:$0xff]  ;;  %v24_v20 = vld [vmem:[%s585_s1 + $0x38] sm:$0xff]  ;;  %v80_v21 = vsel %vm49_vm0, %v27_v18, 0.0  ;;  %v31_v25 = vld [vmem:[%s585_s1 + $0x70] sm:$0xff] }
   0x8   :  { %v86_v22 = vsel %vm49_vm0, %v29_v19, 0.0  ;;  %v71_v23 = vsel %vm49_vm0, %v24_v20, 0.0  ;;  %v28_v24 = vld [vmem:[%s585_s1 + $0x58] sm:$0xff]  ;;  %v30_v26 = vld [vmem:[%s585_s1 + $0x68] sm:$0xff]  ;;  %v92_v28 = vsel %vm49_vm0, %v31_v25, 0.0  ;;  %v33_v32 = vld [vmem:[%s585_s1 + $0x80] sm:$0xff] }
   0x9   :  { %v83_v27 = vsel %vm49_vm0, %v28_v24, 0.0  ;;  %v89_v29 = vsel %vm49_vm0, %v30_v26, 0.0  ;;  %v34_v30 = vld [vmem:[%s585_s1 + $0x88] sm:$0xff]  ;;  %v32_v31 = vld [vmem:[%s585_s1 + $0x78] sm:$0xff]  ;;  %v98_v35 = vsel %vm49_vm0, %v33_v32, 0.0  ;;  %v37_v36 = vld [vmem:[%s585_s1 + $0xa0] sm:$0xff] }
   0xa   :  { %v101_v33 = vsel %vm49_vm0, %v34_v30, 0.0  ;;  %v95_v34 = vsel %vm49_vm0, %v32_v31, 0.0  ;;  %v38_v37 = vld [vmem:[%s585_s1 + $0xa8] sm:$0xff]  ;;  %v35_v38 = vld [vmem:[%s585_s1 + $0x90] sm:$0xff]  ;;  %v110_v39 = vsel %vm49_vm0, %v37_v36, 0.0  ;;  %v41_v43 = vld [vmem:[%s585_s1 + $0xc0] sm:$0xff] }
   0xb   :  { %66 = vadd.xlane.f32.xlu1 %v65_v9  ;;  %69 = vadd.xlane.f32.xlu2 %v68_v10  ;;  %v113_v40 = vsel %vm49_vm0, %v38_v37, 0.0  ;;  %v104_v41 = vsel %vm49_vm0, %v35_v38, 0.0  ;;  %v39_v42 = vld [vmem:[%s585_s1 + $0xb0] sm:$0xff]  ;;  %v36_v44 = vld [vmem:[%s585_s1 + $0x98] sm:$0xff]  ;;  %v122_v46 = vsel %vm49_vm0, %v41_v43, 0.0  ;;  %v42_v50 = vld [vmem:[%s585_s1 + $0xc8] sm:$0xff] }
   0xc   :  { %54 = vadd.xlane.f32.xlu0 %v53_v11  ;;  %v116_v45 = vsel %vm49_vm0, %v39_v42, 0.0  ;;  %v107_v47 = vsel %vm49_vm0, %v36_v44, 0.0  ;;  %v40_v48 = vld [vmem:[%s585_s1 + $0xb8] sm:$0xff]  ;;  %v43_v49 = vld [vmem:[%s585_s1 + $0xd0] sm:$0xff]  ;;  %v125_v53 = vsel %vm49_vm0, %v42_v50, 0.0  ;;  %v46_v54 = vld [vmem:[%s585_s1 + $0xe8] sm:$0xff] }
   0xd   :  { %v119_v51 = vsel %vm49_vm0, %v40_v48, 0.0  ;;  %v128_v52 = vsel %vm49_vm0, %v43_v49, 0.0  ;;  %v44_v55 = vld [vmem:[%s585_s1 + $0xd8] sm:$0xff]  ;;  %v45_v56 = vld [vmem:[%s585_s1 + $0xe0] sm:$0xff]  ;;  %v137_v57 = vsel %vm49_vm0, %v46_v54, 0.0  ;;  %v47_v61 = vld [vmem:[%s585_s1 + $0xf0] sm:$0xff] }
   0xe   :  { %v131_v58 = vsel %vm49_vm0, %v44_v55, 0.0  ;;  %v134_v59 = vsel %vm49_vm0, %v45_v56, 0.0  ;;  %v48_v60 = vld [vmem:[%s585_s1 + $0xf8] sm:$0xff]  ;;  %v140_v63 = vsel %vm49_vm0, %v47_v61, 0.0  ;;  %v494_v4 = vand.u32 127, %v182_v0  ;;  %v148_v42 = vld [vmem:[%s586_s2 + $0x10] sm:$0xff] }
   0xf   :  { %v143_v62 = vsel %vm49_vm0, %v48_v60, 0.0  ;;  %vm195_vm3 = vcmask 261312   ;;  %vm246_vm4 = vcmask 1041409   ;;  %v149_v38 = vld [vmem:[%s586_s2 + $0x18] sm:$0xff]  ;;  %v147_v43 = vld [vmem:[%s586_s2 + $0x8] sm:$0xff]  ;;  %v146_v44 = vld [vmem:[%s586_s2] sm:$0xff] }
  0x10   :  { %v497_v5 = vadd.s32 4294967280, %v494_v4  ;;  %v500_v6 = vadd.s32 4294967288, %v494_v4  ;;  %275 = vmatpush.msra.mxu0 %v149_v38  ;;  %vm248_vm5 = vcmask 1042434   ;;  %vm250_vm6 = vcmask 1043459   ;;  %s340_s11 = smov [#allocation4]   ;;  %s300_s15 = sshll.u32 %s588_s4, 4  ;;  %s301_s15 = int_to_ptr.hbm [resolvable:$true] %s300_s15 }
  0x11   :  { %vm252_vm7 = vcmask 1044484   ;;  %vm254_vm8 = vcmask 1045509   ;;  %vm256_vm9 = vcmask 1046534   ;;  %vm258_vm10 = vcmask 1047559   ;;  %s298_s12 = sshll.u32 %s340_s11, 4  ;;  %s299_s12 = int_to_ptr.vmem [resolvable:$true] %s298_s12 }
  0x12   :  { %276 = vmatpush.msra.mxu0 %v148_v42  ;;  %vm260_vm11 = vcmask 261120  }
  0x13   :  { %78 = vadd.xlane.f32.xlu1 %v77_v15  ;;  %60 = vadd.xlane.f32.xlu2 %v59_v16 }
  0x14   :  { %75 = vadd.xlane.f32.xlu0 %v74_v17  ;;  %277 = vmatpush.msra.mxu0 %v147_v43 }
  0x16   :  { %278 = vmatpush.msra.mxu0 %v146_v44 }
  0x1b   :  { %81 = vadd.xlane.f32.xlu1 %v80_v21  ;;  %87 = vadd.xlane.f32.xlu2 %v86_v22  ;;  %v511_v21 = vadd.s32 4294967272, %v494_v4 }
  0x1c   :  { %72 = vadd.xlane.f32.xlu0 %v71_v23 }
  0x23   :  { %84 = vadd.xlane.f32.xlu1 %v83_v27  ;;  %93 = vadd.xlane.f32.xlu2 %v92_v28 }
  0x24   :  { %90 = vadd.xlane.f32.xlu0 %v89_v29 }
  0x2b   :  { %102 = vadd.xlane.f32.xlu1 %v101_v33  ;;  %96 = vadd.xlane.f32.xlu2 %v95_v34 }
  0x2c   :  { %99 = vadd.xlane.f32.xlu0 %v98_v35 }
  0x33   :  { %111 = vadd.xlane.f32.xlu1 %v110_v39  ;;  %114 = vadd.xlane.f32.xlu2 %v113_v40 }
  0x34   :  { %105 = vadd.xlane.f32.xlu0 %v104_v41 }
  0x3b   :  { %117 = vadd.xlane.f32.xlu1 %v116_v45  ;;  %123 = vadd.xlane.f32.xlu2 %v122_v46 }
  0x3c   :  { %108 = vadd.xlane.f32.xlu0 %v107_v47 }
  0x43   :  { %120 = vadd.xlane.f32.xlu1 %v119_v51  ;;  %129 = vadd.xlane.f32.xlu2 %v128_v52 }
  0x44   :  { %126 = vadd.xlane.f32.xlu0 %v125_v53 }
  0x4b   :  { %138 = vadd.xlane.f32.xlu1 %v137_v57  ;;  %132 = vadd.xlane.f32.xlu2 %v131_v58 }
  0x4c   :  { %135 = vadd.xlane.f32.xlu0 %v134_v59 }
  0x53   :  { %144 = vadd.xlane.f32.xlu1 %v143_v62 }
  0x54   :  { %141 = vadd.xlane.f32.xlu0 %v140_v63 }
  0x76   :  { %v64_v1 = vpop.xlane.xlu1 %63  ;;  %v58_v2 = vpop.xlane.xlu2 %57 }
  0x77   :  { %v52_v3 = vpop.xlane.xlu0 %51  ;;  %v197_v9 = vperm.slane %v64_v1, %v494_v4  ;;  %v190_v10 = vperm.slane %v58_v2, %v497_v5 }
  0x78   :  { %v184_v13 = vperm.slane %v52_v3, %v494_v4 }
  0x7e   :  { %v67_v7 = vpop.xlane.xlu1 %66  ;;  %v70_v8 = vpop.xlane.xlu2 %69 }
  0x7f   :  { %v198_v11 = vperm.slane %v67_v7, %v500_v6  ;;  %v55_v12 = vpop.xlane.xlu0 %54  ;;  %v200_v22 = vperm.slane %v70_v8, %v497_v5 }
  0x80   :  { %v186_v14 = vperm.slane %v55_v12, %v500_v6 }
  0x81   :  { %v199_v15 = vsel %vm187_vm1, %v198_v11, %v197_v9 }
  0x82   :  { %v188_v16 = vsel %vm187_vm1, %v186_v14, %v184_v13  ;;  %v201_v28 = vsel %vm191_vm2, %v200_v22, %v199_v15 }
  0x83   :  { %v192_v17 = vsel %vm191_vm2, %v190_v10, %v188_v16 }
  0x86   :  { %v79_v18 = vpop.xlane.xlu1 %78  ;;  %v61_v19 = vpop.xlane.xlu2 %60 }
  0x87   :  { %v76_v20 = vpop.xlane.xlu0 %75  ;;  %v194_v23 = vperm.slane %v61_v19, %v511_v21  ;;  %v205_v53 = vperm.slane %v79_v18, %v500_v6 }
  0x88   :  { %v204_v54 = vperm.slane %v76_v20, %v494_v4 }
  0x89   :  { %v196_v29 = vsel %vm195_vm3, %v194_v23, %v192_v17 }
  0x8a   :  { %v206_v2 = vsel %vm187_vm1, %v205_v53, %v204_v54 }
  0x8e   :  { %v82_v24 = vpop.xlane.xlu1 %81  ;;  %v88_v25 = vpop.xlane.xlu2 %87 }
  0x8f   :  { %v73_v26 = vpop.xlane.xlu0 %72  ;;  %v211_v51 = vperm.slane %v88_v25, %v494_v4  ;;  %v207_v55 = vperm.slane %v82_v24, %v497_v5 }
  0x90   :  { %v202_v27 = vperm.slane %v73_v26, %v511_v21 }
  0x91   :  { %v208_v10 = vsel %vm191_vm2, %v207_v55, %v206_v2 }
  0x92   :  { %v203_v30 = vsel %vm195_vm3, %v202_v27, %v201_v28 }
  0x93   :  { %v247_v31 = vsel %vm246_vm4, %v203_v30, %v196_v29 }
  0x96   :  { %v85_v32 = vpop.xlane.xlu1 %84  ;;  %v94_v33 = vpop.xlane.xlu2 %93 }
  0x97   :  { %v91_v34 = vpop.xlane.xlu0 %90  ;;  %v209_v57 = vperm.slane %v85_v32, %v511_v21  ;;  %v214_v58 = vperm.slane %v94_v33, %v497_v5 }
  0x98   :  { %v212_v52 = vperm.slane %v91_v34, %v500_v6 }
  0x99   :  { %v210_v13 = vsel %vm195_vm3, %v209_v57, %v208_v10 }
  0x9a   :  { %v213_v59 = vsel %vm187_vm1, %v212_v52, %v211_v51  ;;  %v249_v26 = vsel %vm248_vm5, %v210_v13, %v247_v31 }
  0x9b   :  { %v215_v14 = vsel %vm191_vm2, %v214_v58, %v213_v59 }
  0x9e   :  { %v103_v35 = vpop.xlane.xlu1 %102  ;;  %v97_v36 = vpop.xlane.xlu2 %96 }
  0x9f   :  { %v100_v37 = vpop.xlane.xlu0 %99  ;;  %v219_v60 = vperm.slane %v103_v35, %v500_v6  ;;  %v216_v62 = vperm.slane %v97_v36, %v511_v21 }
  0xa0   :  { %v218_v63 = vperm.slane %v100_v37, %v494_v4 }
  0xa1   :  { %v217_v17 = vsel %vm195_vm3, %v216_v62, %v215_v14 }
  0xa2   :  { %v220_v18 = vsel %vm187_vm1, %v219_v60, %v218_v63 }
  0xa6   :  { %v112_v39 = vpop.xlane.xlu1 %111  ;;  %v115_v40 = vpop.xlane.xlu2 %114 }
  0xa7   :  { %v106_v41 = vpop.xlane.xlu0 %105  ;;  %v225_v3 = vperm.slane %v112_v39, %v494_v4  ;;  %v226_v7 = vperm.slane %v115_v40, %v500_v6 }
  0xa8   :  { %v221_v8 = vperm.slane %v106_v41, %v497_v5  ;;  %v284_v41 = vstv %s584_s0 }
  0xa9   :  { %v227_v22 = vsel %vm187_vm1, %v226_v7, %v225_v3 }
  0xaa   :  { %v222_v23 = vsel %vm191_vm2, %v221_v8, %v220_v18 }
  0xae   :  { %v118_v45 = vpop.xlane.xlu1 %117  ;;  %v124_v46 = vpop.xlane.xlu2 %123 }
  0xaf   :  { %v109_v47 = vpop.xlane.xlu0 %108  ;;  %v232_v0 = vperm.slane %v124_v46, %v494_v4  ;;  %v228_v11 = vperm.slane %v118_v45, %v497_v5 }
  0xb0   :  { %v223_v12 = vperm.slane %v109_v47, %v511_v21 }
  0xb1   :  { %v229_v27 = vsel %vm191_vm2, %v228_v11, %v227_v22 }
  0xb2   :  { %v224_v28 = vsel %vm195_vm3, %v223_v12, %v222_v23 }
  0xb6   :  { %v121_v48 = vpop.xlane.xlu1 %120  ;;  %v130_v49 = vpop.xlane.xlu2 %129 }
  0xb7   :  { %v127_v50 = vpop.xlane.xlu0 %126  ;;  %v230_v15 = vperm.slane %v121_v48, %v511_v21  ;;  %v235_v16 = vperm.slane %v130_v49, %v497_v5 }
  0xb8   :  { %v233_v1 = vperm.slane %v127_v50, %v500_v6 }
  0xb9   :  { %v231_v30 = vsel %vm195_vm3, %v230_v15, %v229_v27 }
  0xba   :  { %v234_v19 = vsel %vm187_vm1, %v233_v1, %v232_v0 }
  0xbb   :  { %v236_v32 = vsel %vm191_vm2, %v235_v16, %v234_v19 }
  0xbe   :  { %v139_v56 = vpop.xlane.xlu1 %138  ;;  %v133_v9 = vpop.xlane.xlu2 %132 }
  0xbf   :  { %v136_v61 = vpop.xlane.xlu0 %135  ;;  %v237_v20 = vperm.slane %v133_v9, %v511_v21  ;;  %v240_v24 = vperm.slane %v139_v56, %v500_v6  ;;  %v251_v6 = vsel %vm250_vm6, %v217_v17, %v249_v26 }
  0xc0   :  { %v239_v25 = vperm.slane %v136_v61, %v494_v4  ;;  %v253_v35 = vsel %vm252_vm7, %v224_v28, %v251_v6 }
  0xc1   :  { %v238_v4 = vsel %vm195_vm3, %v237_v20, %v236_v32  ;;  %v255_v38 = vsel %vm254_vm8, %v231_v30, %v253_v35 }
  0xc2   :  { %v241_v36 = vsel %vm187_vm1, %v240_v24, %v239_v25  ;;  %v257_v40 = vsel %vm256_vm9, %v238_v4, %v255_v38 }
  0xc6   :  { %v145_v29 = vpop.xlane.xlu1 %144 }
  0xc7   :  { %v142_v33 = vpop.xlane.xlu0 %141  ;;  %v244_v34 = vperm.slane %v145_v29, %v511_v21 }
  0xc8   :  { %v242_v31 = vperm.slane %v142_v33, %v497_v5  ;;  %v311_v5 = vld [vmem:[%s587_s3] ss:$0 sm:$0xff] }
  0xca   :  { %v243_v37 = vsel %vm191_vm2, %v242_v31, %v241_v36 }
  0xcb   :  { %v245_v39 = vsel %vm195_vm3, %v244_v34, %v243_v37 }
  0xcc   :  { %v259_v21 = vsel %vm258_vm10, %v245_v39, %v257_v40 }
  0xcd   :  { %309 = vmatmul.msk.f32.vlgmr.msra.gmra.mxu0 %vm260_vm11, %v259_v21 }
 0x14a   :  { %v280_v42 = vpop.f32.mrf.mxu0 }
 0x14b   :  { %v285_v43 = vmul.f32 %v284_v41, %v280_v42 }
 0x14d   :  { %v290_v44 = vadd.f32 %v311_v5, %v285_v43 }
 0x14f   :  { %312 = vtanh.f32 %v290_v44 }
 0x155   :  { %v313_v45 = vpop.eup %312 }
 0x156   :  { %292 = vst [vmem:[#allocation4] sm:$0xff] %v313_v45 }
 0x157   :  { %303 = dma.vmem_to_hbm [thread:$0]  %s299_s12, 128, %s301_s15, [#allocation5]  }
 0x158   :  { %338 = dma.done.wait [#allocation5], 128  }
 0x159   :  { %339 = vsyncadd [#allocation5], 4294967168 }
 0x15a   :  { %308 = vsyncpa [#allocation5], 1 }

</bundles_post_ra>
